<compile_context>
chip_gen: v7x
topology: tpu7x:2x2x1
jax: 0.10.0
libtpu: 0.0.40
codegen_flags: <defaults>
</compile_context>

<pallas_src>
import jax
import jax.numpy as jnp
from jax.experimental import pallas as pl
from jax.experimental.pallas import tpu as pltpu

EPS = 1e-5  # nn.InstanceNorm2d default


# ---------------- in-kernel helpers ----------------

def _instance_norm_rows(y):
    # y: (R, L). Normalize each row over the lane axis (biased var, no affine).
    inv_n = 1.0 / y.shape[-1]
    mean = jnp.sum(y, axis=-1, keepdims=True) * inv_n
    mean_sq = jnp.sum(y * y, axis=-1, keepdims=True) * inv_n
    var = jnp.maximum(mean_sq - mean * mean, 0.0)  # guard single-pass cancellation
    return (y - mean) * jax.lax.rsqrt(var + EPS)


def _make_kernel(N, C, H, W):
    """Build the whole-batch BasicBlock kernel for images of size H x W."""
    L = H * W
    R = N * C

    def lane_shift(x, d):
        # out[..., p] = x[..., (p + d) % L]   (pltpu.roll has jnp.roll semantics)
        return pltpu.roll(x, shift=(-d) % L, axis=1)

    def conv3x3_reflect(x, a_mat, masks, taps_ref):
        # x: (R, L) rows = flattened per-(image, channel) spatial maps.
        # a_mat: (R, 9*R) flattened block-diagonal weights (no bias: cancelled
        # exactly by the following InstanceNorm mean subtraction).
        h_first, h_last, w_first, w_last = masks
        # 2 row rolls total: the opposite-direction roll is the reflect value.
        up_raw = lane_shift(x, -W)      # neighbor above (dy = -1) away from edges
        down_raw = lane_shift(x, +W)    # neighbor below (dy = +1)
        rows = (jnp.where(h_first, down_raw, up_raw),   # ky = 0
                x,                                      # ky = 1
                jnp.where(h_last, up_raw, down_raw))    # ky = 2
        for ky, r in enumerate(rows):
            # 2 column rolls per row (6 total); reuse for both edges.
            left_raw = lane_shift(r, -1)    # dx = -1
            right_raw = lane_shift(r, +1)   # dx = +1
            taps_ref[pl.ds((ky * 3 + 0) * R, R), :] = jnp.where(w_first, right_raw, left_raw)
            taps_ref[pl.ds((ky * 3 + 1) * R, R), :] = r
            taps_ref[pl.ds((ky * 3 + 2) * R, R), :] = jnp.where(w_last, left_raw, right_raw)
        return jnp.dot(a_mat, taps_ref[...], preferred_element_type=jnp.float32)

    def kernel(x_ref, a1_ref, a2_ref, o_ref, taps_ref):
        x = x_ref[...]                                    # (N*C, H*W) float32
        # Edge masks (lane-position only); constant compares, computed once.
        p = jax.lax.broadcasted_iota(jnp.int32, (R, L), 1)
        wi = p % W                    # W is a power of two here -> bitwise AND
        masks = (p < W, p >= L - W, wi == 0, wi == W - 1)

        y = conv3x3_reflect(x, a1_ref[...], masks, taps_ref)
        y = _instance_norm_rows(y)
        # nn.LeakyReLU(True): negative_slope = 1.0 -> exact identity; omitted.
        y = conv3x3_reflect(y, a2_ref[...], masks, taps_ref)
        y = _instance_norm_rows(y)
        o_ref[...] = y.astype(o_ref.dtype)

    return kernel


# ---------------- wrapper ----------------

def basic_block(x_nchw, w1, b1, w2, b2):
    """x_nchw: (N, C, H, W); w*: (C_out, C_in, 3, 3) PyTorch layout; b*: (C,)."""
    N, C, H, W = x_nchw.shape
    NC, L = N * C, H * W

    # Contiguous reshape (no transpose): rows are (n, c) flattened spatial maps.
    x2d = x_nchw.reshape(NC, L).astype(jnp.float32)

    eye_n = jnp.eye(N, dtype=jnp.float32)

    def flatten_weight(w):
        # (C_out, C_in, 3, 3) -> (N*C, 9*N*C): per-tap C_out x C_in block made
        # block-diagonal over images, taps concatenated along the contraction
        # axis in (ky, kx) order (matching the taps order in the kernel).
        blocks = [jnp.kron(eye_n, w[:, :, ky, kx].astype(jnp.float32))
                  for ky in range(3) for kx in range(3)]
        return jnp.concatenate(blocks, axis=1)

    a1 = flatten_weight(w1)
    a2 = flatten_weight(w2)
    # Conv biases b1/b2 are dropped on purpose: InstanceNorm2d(affine=False)
    # subtracts the per-(n, c) spatial mean right after each conv, so a
    # per-channel constant bias cancels exactly (reference below keeps them).
    del b1, b2

    kernel = _make_kernel(N, C, H, W)

    # Single grid-less invocation: whole batch resident in VMEM (a few KiB).
    # TODO(synk): at production sizes (large H*W / C), tile over images with a
    # grid axis (keep the weight at (C, 9C) instead of the kron block-diagonal),
    # mark it dimension_semantics=("parallel",) for v7x's two TensorCores, and
    # budget VMEM for the 9x tap scratch (re-derive tiles for v7x's 64 MiB and
    # set vmem_limit_bytes explicitly).
    out2d = pl.pallas_call(
        kernel,
        out_shape=jax.ShapeDtypeStruct((NC, L), jnp.float32),
        in_specs=[
            pl.BlockSpec((NC, L), lambda: (0, 0)),
            pl.BlockSpec(a1.shape, lambda: (0, 0)),
            pl.BlockSpec(a2.shape, lambda: (0, 0)),
        ],
        out_specs=pl.BlockSpec((NC, L), lambda: (0, 0)),
        scratch_shapes=[pltpu.VMEM((9 * NC, L), jnp.float32)],
    )(x2d, a1, a2)

    return out2d.reshape(N, C, H, W).astype(x_nchw.dtype)


# ---------------- pure-JAX reference (for correctness check) ----------------

def _ref_forward(x, w1, b1, w2, b2):
    def conv(xin, w, b):
        xp = jnp.pad(xin, ((0, 0), (0, 0), (1, 1), (1, 1)), mode="reflect")
        y = jax.lax.conv_general_dilated(
            xp, w, window_strides=(1, 1), padding="VALID",
            dimension_numbers=("NCHW", "OIHW", "NCHW"))
        return y + b.reshape(1, -1, 1, 1)

    def inorm(y):
        m = jnp.mean(y, axis=(2, 3), keepdims=True)
        v = jnp.mean((y - m) ** 2, axis=(2, 3), keepdims=True)
        return (y - m) / jnp.sqrt(v + EPS)

    y = inorm(conv(x, w1, b1))
    y = jnp.where(y >= 0, y, 1.0 * y)   # LeakyReLU(negative_slope=1.0) == identity
    y = inorm(conv(y, w2, b2))
    return y


if __name__ == "__main__":
    N, C, H, W = 2, 4, 16, 16
    key = jax.random.PRNGKey(0)
    kx, k1, kb1, k2, kb2 = jax.random.split(key, 5)

    x = jax.random.normal(kx, (N, C, H, W), dtype=jnp.float32)
    # deterministic synthetic parameters (Conv2d(dim, dim, 3, bias=True) x 2)
    w1 = jax.random.normal(k1, (C, C, 3, 3), dtype=jnp.float32) * 0.1
    b1 = jax.random.normal(kb1, (C,), dtype=jnp.float32) * 0.1
    w2 = jax.random.normal(k2, (C, C, 3, 3), dtype=jnp.float32) * 0.1
    b2 = jax.random.normal(kb2, (C,), dtype=jnp.float32) * 0.1

    out = basic_block(x, w1, b1, w2, b2)
    out = jax.block_until_ready(out)

    ref = _ref_forward(x, w1, b1, w2, b2)
    assert out.shape == (N, C, H, W)
    assert jnp.allclose(out, ref, atol=1e-4, rtol=1e-4), "mismatch vs JAX reference"

    print("KERNEL_OK")
</pallas_src>

<mosaic_0001>
module attributes {stable_mosaic.version = 11 : i64} {
  func.func @kernel(%arg0: memref<8x256xf32, #tpu.memory_space<vmem>>, %arg1: memref<8x72xf32, #tpu.memory_space<vmem>>, %arg2: memref<8x72xf32, #tpu.memory_space<vmem>>, %arg3: memref<8x256xf32, #tpu.memory_space<vmem>>, %arg4: memref<72x256xf32, #tpu.memory_space<vmem>>) attributes {dimension_semantics = [], scalar_prefetch = 0 : i64, scratch_operands = 1 : i64, tpu.core_type = #tpu.core_type<tc>} {
    %c0 = arith.constant 0 : index
    %c0_0 = arith.constant 0 : index
    %0 = vector.load %arg0[%c0, %c0_0] : memref<8x256xf32, #tpu.memory_space<vmem>>, vector<8x256xf32>
    %1 = tpu.iota {dimensions = array<i32: 1>} : vector<8x256xi32>
    %c16_i32 = arith.constant 16 : i32
    %c0_i32 = arith.constant 0 : i32
    %2 = arith.cmpi eq, %c16_i32, %c0_i32 : i32
    %c1_i32 = arith.constant 1 : i32
    %3 = arith.select %2, %c1_i32, %c16_i32 : i32
    %4 = vector.broadcast %3 : i32 to vector<8x256xi32>
    %5 = arith.remsi %1, %4 : vector<8x256xi32>
    %c0_i32_1 = arith.constant 0 : i32
    %6 = vector.broadcast %c0_i32_1 : i32 to vector<8x256xi32>
    %7 = arith.cmpi ne, %5, %6 : vector<8x256xi32>
    %c0_i32_2 = arith.constant 0 : i32
    %8 = vector.broadcast %c0_i32_2 : i32 to vector<8x256xi32>
    %9 = arith.cmpi slt, %5, %8 : vector<8x256xi32>
    %c0_i32_3 = arith.constant 0 : i32
    %10 = arith.cmpi slt, %3, %c0_i32_3 : i32
    %11 = vector.broadcast %10 : i1 to vector<8x256xi1>
    %12 = vector.broadcast %11 : vector<8x256xi1> to vector<8x256xi1>
    %13 = arith.xori %9, %12 : vector<8x256xi1>
    %14 = arith.andi %13, %7 : vector<8x256xi1>
    %15 = vector.broadcast %3 : i32 to vector<8x256xi32>
    %16 = arith.addi %5, %15 : vector<8x256xi32>
    %17 = arith.select %14, %16, %5 : vector<8x256xi1>, vector<8x256xi32>
    %c16_i32_4 = arith.constant 16 : i32
    %18 = vector.broadcast %c16_i32_4 : i32 to vector<8x256xi32>
    %19 = arith.cmpi slt, %1, %18 : vector<8x256xi32>
    %c240_i32 = arith.constant 240 : i32
    %20 = vector.broadcast %c240_i32 : i32 to vector<8x256xi32>
    %21 = arith.cmpi sge, %1, %20 : vector<8x256xi32>
    %c0_i32_5 = arith.constant 0 : i32
    %22 = vector.broadcast %c0_i32_5 : i32 to vector<8x256xi32>
    %23 = arith.cmpi eq, %17, %22 : vector<8x256xi32>
    %c15_i32 = arith.constant 15 : i32
    %24 = vector.broadcast %c15_i32 : i32 to vector<8x256xi32>
    %25 = arith.cmpi eq, %17, %24 : vector<8x256xi32>
    %c0_6 = arith.constant 0 : index
    %c0_7 = arith.constant 0 : index
    %26 = vector.load %arg1[%c0_6, %c0_7] : memref<8x72xf32, #tpu.memory_space<vmem>>, vector<8x72xf32>
    %c16_i32_8 = arith.constant 16 : i32
    %27 = tpu.dynamic_rotate %0 by %c16_i32_8 dim 1 : vector<8x256xf32>, i32 -> vector<8x256xf32>
    %c240_i32_9 = arith.constant 240 : i32
    %28 = tpu.dynamic_rotate %0 by %c240_i32_9 dim 1 : vector<8x256xf32>, i32 -> vector<8x256xf32>
    %29 = arith.select %19, %28, %27 : vector<8x256xi1>, vector<8x256xf32>
    %30 = arith.select %21, %27, %28 : vector<8x256xi1>, vector<8x256xf32>
    %c1_i32_10 = arith.constant 1 : i32
    %31 = tpu.dynamic_rotate %29 by %c1_i32_10 dim 1 : vector<8x256xf32>, i32 -> vector<8x256xf32>
    %c255_i32 = arith.constant 255 : i32
    %32 = tpu.dynamic_rotate %29 by %c255_i32 dim 1 : vector<8x256xf32>, i32 -> vector<8x256xf32>
    %33 = arith.select %23, %32, %31 : vector<8x256xi1>, vector<8x256xf32>
    %c0_11 = arith.constant 0 : index
    %c0_12 = arith.constant 0 : index
    %34 = vector.load %arg4[%c0_11, %c0_12] : memref<72x256xf32, #tpu.memory_space<vmem>>, vector<8x256xf32>
    tpu.vector_store %arg4[%c0_11, %c0_12], %33 {strides = array<i32>} : memref<72x256xf32, #tpu.memory_space<vmem>>, vector<8x256xf32>,
    %c8 = arith.constant 8 : index
    %c0_13 = arith.constant 0 : index
    %35 = vector.load %arg4[%c8, %c0_13] : memref<72x256xf32, #tpu.memory_space<vmem>>, vector<8x256xf32>
    tpu.vector_store %arg4[%c8, %c0_13], %29 {strides = array<i32>} : memref<72x256xf32, #tpu.memory_space<vmem>>, vector<8x256xf32>,
    %36 = arith.select %25, %31, %32 : vector<8x256xi1>, vector<8x256xf32>
    %c16 = arith.constant 16 : index
    %c0_14 = arith.constant 0 : index
    %37 = vector.load %arg4[%c16, %c0_14] : memref<72x256xf32, #tpu.memory_space<vmem>>, vector<8x256xf32>
    tpu.vector_store %arg4[%c16, %c0_14], %36 {strides = array<i32>} : memref<72x256xf32, #tpu.memory_space<vmem>>, vector<8x256xf32>,
    %c1_i32_15 = arith.constant 1 : i32
    %38 = tpu.dynamic_rotate %0 by %c1_i32_15 dim 1 : vector<8x256xf32>, i32 -> vector<8x256xf32>
    %c255_i32_16 = arith.constant 255 : i32
    %39 = tpu.dynamic_rotate %0 by %c255_i32_16 dim 1 : vector<8x256xf32>, i32 -> vector<8x256xf32>
    %40 = arith.select %23, %39, %38 : vector<8x256xi1>, vector<8x256xf32>
    %c24 = arith.constant 24 : index
    %c0_17 = arith.constant 0 : index
    %41 = vector.load %arg4[%c24, %c0_17] : memref<72x256xf32, #tpu.memory_space<vmem>>, vector<8x256xf32>
    tpu.vector_store %arg4[%c24, %c0_17], %40 {strides = array<i32>} : memref<72x256xf32, #tpu.memory_space<vmem>>, vector<8x256xf32>,
    %c32 = arith.constant 32 : index
    %c0_18 = arith.constant 0 : index
    %42 = vector.load %arg4[%c32, %c0_18] : memref<72x256xf32, #tpu.memory_space<vmem>>, vector<8x256xf32>
    tpu.vector_store %arg4[%c32, %c0_18], %0 {strides = array<i32>} : memref<72x256xf32, #tpu.memory_space<vmem>>, vector<8x256xf32>,
    %43 = arith.select %25, %38, %39 : vector<8x256xi1>, vector<8x256xf32>
    %c40 = arith.constant 40 : index
    %c0_19 = arith.constant 0 : index
    %44 = vector.load %arg4[%c40, %c0_19] : memref<72x256xf32, #tpu.memory_space<vmem>>, vector<8x256xf32>
    tpu.vector_store %arg4[%c40, %c0_19], %43 {strides = array<i32>} : memref<72x256xf32, #tpu.memory_space<vmem>>, vector<8x256xf32>,
    %c1_i32_20 = arith.constant 1 : i32
    %45 = tpu.dynamic_rotate %30 by %c1_i32_20 dim 1 : vector<8x256xf32>, i32 -> vector<8x256xf32>
    %c255_i32_21 = arith.constant 255 : i32
    %46 = tpu.dynamic_rotate %30 by %c255_i32_21 dim 1 : vector<8x256xf32>, i32 -> vector<8x256xf32>
    %47 = arith.select %23, %46, %45 : vector<8x256xi1>, vector<8x256xf32>
    %c48 = arith.constant 48 : index
    %c0_22 = arith.constant 0 : index
    %48 = vector.load %arg4[%c48, %c0_22] : memref<72x256xf32, #tpu.memory_space<vmem>>, vector<8x256xf32>
    tpu.vector_store %arg4[%c48, %c0_22], %47 {strides = array<i32>} : memref<72x256xf32, #tpu.memory_space<vmem>>, vector<8x256xf32>,
    %c56 = arith.constant 56 : index
    %c0_23 = arith.constant 0 : index
    %49 = vector.load %arg4[%c56, %c0_23] : memref<72x256xf32, #tpu.memory_space<vmem>>, vector<8x256xf32>
    tpu.vector_store %arg4[%c56, %c0_23], %30 {strides = array<i32>} : memref<72x256xf32, #tpu.memory_space<vmem>>, vector<8x256xf32>,
    %50 = arith.select %25, %45, %46 : vector<8x256xi1>, vector<8x256xf32>
    %c64 = arith.constant 64 : index
    %c0_24 = arith.constant 0 : index
    %51 = vector.load %arg4[%c64, %c0_24] : memref<72x256xf32, #tpu.memory_space<vmem>>, vector<8x256xf32>
    tpu.vector_store %arg4[%c64, %c0_24], %50 {strides = array<i32>} : memref<72x256xf32, #tpu.memory_space<vmem>>, vector<8x256xf32>,
    %c0_25 = arith.constant 0 : index
    %c0_26 = arith.constant 0 : index
    %52 = vector.load %arg4[%c0_25, %c0_26] : memref<72x256xf32, #tpu.memory_space<vmem>>, vector<72x256xf32>
    %cst = arith.constant dense<0.000000e+00> : vector<8x256xf32>
    %53 = tpu.matmul %26, %52, %cst {dimension_numbers = #tpu.dot_dimension_numbers<[1], [0], [0], [1], [0, 0, 1, 1], [], []>} : vector<8x72xf32>, vector<72x256xf32>, vector<8x256xf32> -> vector<8x256xf32>
    %cst_27 = arith.constant dense<0.000000e+00> : vector<8xf32>
    %54 = vector.multi_reduction <add>, %53, %cst_27 [1] : vector<8x256xf32> to vector<8xf32>
    %55 = vector.shape_cast %54 : vector<8xf32> to vector<8x1xf32>
    %cst_28 = arith.constant 3.906250e-03 : f32
    %56 = vector.broadcast %cst_28 : f32 to vector<8x1xf32>
    %57 = arith.mulf %55, %56 : vector<8x1xf32>
    %58 = arith.mulf %53, %53 : vector<8x256xf32>
    %cst_29 = arith.constant dense<0.000000e+00> : vector<8xf32>
    %59 = vector.multi_reduction <add>, %58, %cst_29 [1] : vector<8x256xf32> to vector<8xf32>
    %60 = vector.shape_cast %59 : vector<8xf32> to vector<8x1xf32>
    %cst_30 = arith.constant 3.906250e-03 : f32
    %61 = vector.broadcast %cst_30 : f32 to vector<8x1xf32>
    %62 = arith.mulf %60, %61 : vector<8x1xf32>
    %63 = arith.mulf %57, %57 : vector<8x1xf32>
    %64 = arith.subf %62, %63 : vector<8x1xf32>
    %cst_31 = arith.constant 0.000000e+00 : f32
    %65 = vector.broadcast %cst_31 : f32 to vector<8x1xf32>
    %66 = arith.maximumf %64, %65 : vector<8x1xf32>
    %67 = vector.broadcast %57 : vector<8x1xf32> to vector<8x256xf32>
    %68 = arith.subf %53, %67 : vector<8x256xf32>
    %cst_32 = arith.constant 9.99999974E-6 : f32
    %69 = vector.broadcast %cst_32 : f32 to vector<8x1xf32>
    %70 = arith.addf %66, %69 : vector<8x1xf32>
    %71 = math.rsqrt %70 : vector<8x1xf32>
    %72 = vector.broadcast %71 : vector<8x1xf32> to vector<8x256xf32>
    %73 = arith.mulf %68, %72 : vector<8x256xf32>
    %c0_33 = arith.constant 0 : index
    %c0_34 = arith.constant 0 : index
    %74 = vector.load %arg2[%c0_33, %c0_34] : memref<8x72xf32, #tpu.memory_space<vmem>>, vector<8x72xf32>
    %c16_i32_35 = arith.constant 16 : i32
    %75 = tpu.dynamic_rotate %73 by %c16_i32_35 dim 1 : vector<8x256xf32>, i32 -> vector<8x256xf32>
    %c240_i32_36 = arith.constant 240 : i32
    %76 = tpu.dynamic_rotate %73 by %c240_i32_36 dim 1 : vector<8x256xf32>, i32 -> vector<8x256xf32>
    %77 = arith.select %19, %76, %75 : vector<8x256xi1>, vector<8x256xf32>
    %78 = arith.select %21, %75, %76 : vector<8x256xi1>, vector<8x256xf32>
    %c1_i32_37 = arith.constant 1 : i32
    %79 = tpu.dynamic_rotate %77 by %c1_i32_37 dim 1 : vector<8x256xf32>, i32 -> vector<8x256xf32>
    %c255_i32_38 = arith.constant 255 : i32
    %80 = tpu.dynamic_rotate %77 by %c255_i32_38 dim 1 : vector<8x256xf32>, i32 -> vector<8x256xf32>
    %81 = arith.select %23, %80, %79 : vector<8x256xi1>, vector<8x256xf32>
    %c0_39 = arith.constant 0 : index
    %c0_40 = arith.constant 0 : index
    %82 = vector.load %arg4[%c0_39, %c0_40] : memref<72x256xf32, #tpu.memory_space<vmem>>, vector<8x256xf32>
    tpu.vector_store %arg4[%c0_39, %c0_40], %81 {strides = array<i32>} : memref<72x256xf32, #tpu.memory_space<vmem>>, vector<8x256xf32>,
    %c8_41 = arith.constant 8 : index
    %c0_42 = arith.constant 0 : index
    %83 = vector.load %arg4[%c8_41, %c0_42] : memref<72x256xf32, #tpu.memory_space<vmem>>, vector<8x256xf32>
    tpu.vector_store %arg4[%c8_41, %c0_42], %77 {strides = array<i32>} : memref<72x256xf32, #tpu.memory_space<vmem>>, vector<8x256xf32>,
    %84 = arith.select %25, %79, %80 : vector<8x256xi1>, vector<8x256xf32>
    %c16_43 = arith.constant 16 : index
    %c0_44 = arith.constant 0 : index
    %85 = vector.load %arg4[%c16_43, %c0_44] : memref<72x256xf32, #tpu.memory_space<vmem>>, vector<8x256xf32>
    tpu.vector_store %arg4[%c16_43, %c0_44], %84 {strides = array<i32>} : memref<72x256xf32, #tpu.memory_space<vmem>>, vector<8x256xf32>,
    %c1_i32_45 = arith.constant 1 : i32
    %86 = tpu.dynamic_rotate %73 by %c1_i32_45 dim 1 : vector<8x256xf32>, i32 -> vector<8x256xf32>
    %c255_i32_46 = arith.constant 255 : i32
    %87 = tpu.dynamic_rotate %73 by %c255_i32_46 dim 1 : vector<8x256xf32>, i32 -> vector<8x256xf32>
    %88 = arith.select %23, %87, %86 : vector<8x256xi1>, vector<8x256xf32>
    %c24_47 = arith.constant 24 : index
    %c0_48 = arith.constant 0 : index
    %89 = vector.load %arg4[%c24_47, %c0_48] : memref<72x256xf32, #tpu.memory_space<vmem>>, vector<8x256xf32>
    tpu.vector_store %arg4[%c24_47, %c0_48], %88 {strides = array<i32>} : memref<72x256xf32, #tpu.memory_space<vmem>>, vector<8x256xf32>,
    %c32_49 = arith.constant 32 : index
    %c0_50 = arith.constant 0 : index
    %90 = vector.load %arg4[%c32_49, %c0_50] : memref<72x256xf32, #tpu.memory_space<vmem>>, vector<8x256xf32>
    tpu.vector_store %arg4[%c32_49, %c0_50], %73 {strides = array<i32>} : memref<72x256xf32, #tpu.memory_space<vmem>>, vector<8x256xf32>,
    %91 = arith.select %25, %86, %87 : vector<8x256xi1>, vector<8x256xf32>
    %c40_51 = arith.constant 40 : index
    %c0_52 = arith.constant 0 : index
    %92 = vector.load %arg4[%c40_51, %c0_52] : memref<72x256xf32, #tpu.memory_space<vmem>>, vector<8x256xf32>
    tpu.vector_store %arg4[%c40_51, %c0_52], %91 {strides = array<i32>} : memref<72x256xf32, #tpu.memory_space<vmem>>, vector<8x256xf32>,
    %c1_i32_53 = arith.constant 1 : i32
    %93 = tpu.dynamic_rotate %78 by %c1_i32_53 dim 1 : vector<8x256xf32>, i32 -> vector<8x256xf32>
    %c255_i32_54 = arith.constant 255 : i32
    %94 = tpu.dynamic_rotate %78 by %c255_i32_54 dim 1 : vector<8x256xf32>, i32 -> vector<8x256xf32>
    %95 = arith.select %23, %94, %93 : vector<8x256xi1>, vector<8x256xf32>
    %c48_55 = arith.constant 48 : index
    %c0_56 = arith.constant 0 : index
    %96 = vector.load %arg4[%c48_55, %c0_56] : memref<72x256xf32, #tpu.memory_space<vmem>>, vector<8x256xf32>
    tpu.vector_store %arg4[%c48_55, %c0_56], %95 {strides = array<i32>} : memref<72x256xf32, #tpu.memory_space<vmem>>, vector<8x256xf32>,
    %c56_57 = arith.constant 56 : index
    %c0_58 = arith.constant 0 : index
    %97 = vector.load %arg4[%c56_57, %c0_58] : memref<72x256xf32, #tpu.memory_space<vmem>>, vector<8x256xf32>
    tpu.vector_store %arg4[%c56_57, %c0_58], %78 {strides = array<i32>} : memref<72x256xf32, #tpu.memory_space<vmem>>, vector<8x256xf32>,
    %98 = arith.select %25, %93, %94 : vector<8x256xi1>, vector<8x256xf32>
    %c64_59 = arith.constant 64 : index
    %c0_60 = arith.constant 0 : index
    %99 = vector.load %arg4[%c64_59, %c0_60] : memref<72x256xf32, #tpu.memory_space<vmem>>, vector<8x256xf32>
    tpu.vector_store %arg4[%c64_59, %c0_60], %98 {strides = array<i32>} : memref<72x256xf32, #tpu.memory_space<vmem>>, vector<8x256xf32>,
    %c0_61 = arith.constant 0 : index
    %c0_62 = arith.constant 0 : index
    %100 = vector.load %arg4[%c0_61, %c0_62] : memref<72x256xf32, #tpu.memory_space<vmem>>, vector<72x256xf32>
    %cst_63 = arith.constant dense<0.000000e+00> : vector<8x256xf32>
    %101 = tpu.matmul %74, %100, %cst_63 {dimension_numbers = #tpu.dot_dimension_numbers<[1], [0], [0], [1], [0, 0, 1, 1], [], []>} : vector<8x72xf32>, vector<72x256xf32>, vector<8x256xf32> -> vector<8x256xf32>
    %cst_64 = arith.constant dense<0.000000e+00> : vector<8xf32>
    %102 = vector.multi_reduction <add>, %101, %cst_64 [1] : vector<8x256xf32> to vector<8xf32>
    %103 = vector.shape_cast %102 : vector<8xf32> to vector<8x1xf32>
    %cst_65 = arith.constant 3.906250e-03 : f32
    %104 = vector.broadcast %cst_65 : f32 to vector<8x1xf32>
    %105 = arith.mulf %103, %104 : vector<8x1xf32>
    %106 = arith.mulf %101, %101 : vector<8x256xf32>
    %cst_66 = arith.constant dense<0.000000e+00> : vector<8xf32>
    %107 = vector.multi_reduction <add>, %106, %cst_66 [1] : vector<8x256xf32> to vector<8xf32>
    %108 = vector.shape_cast %107 : vector<8xf32> to vector<8x1xf32>
    %cst_67 = arith.constant 3.906250e-03 : f32
    %109 = vector.broadcast %cst_67 : f32 to vector<8x1xf32>
    %110 = arith.mulf %108, %109 : vector<8x1xf32>
    %111 = arith.mulf %105, %105 : vector<8x1xf32>
    %112 = arith.subf %110, %111 : vector<8x1xf32>
    %cst_68 = arith.constant 0.000000e+00 : f32
    %113 = vector.broadcast %cst_68 : f32 to vector<8x1xf32>
    %114 = arith.maximumf %112, %113 : vector<8x1xf32>
    %115 = vector.broadcast %105 : vector<8x1xf32> to vector<8x256xf32>
    %116 = arith.subf %101, %115 : vector<8x256xf32>
    %cst_69 = arith.constant 9.99999974E-6 : f32
    %117 = vector.broadcast %cst_69 : f32 to vector<8x1xf32>
    %118 = arith.addf %114, %117 : vector<8x1xf32>
    %119 = math.rsqrt %118 : vector<8x1xf32>
    %120 = vector.broadcast %119 : vector<8x1xf32> to vector<8x256xf32>
    %121 = arith.mulf %116, %120 : vector<8x256xf32>
    %c0_70 = arith.constant 0 : index
    %c0_71 = arith.constant 0 : index
    %122 = vector.load %arg3[%c0_70, %c0_71] : memref<8x256xf32, #tpu.memory_space<vmem>>, vector<8x256xf32>
    tpu.vector_store %arg3[%c0_70, %c0_71], %121 {strides = array<i32>} : memref<8x256xf32, #tpu.memory_space<vmem>>, vector<8x256xf32>,
    return
  }
}

</mosaic_0001>

<bundles_post_ra>
// kernel: tpu_custom_call.1
= control target key start
LH: loop header
LB: loop body
LE: loop exit
PB: predicated region body
PF: predicated region fallthrough
CT: control target
= control target key end

     0   :  { %8 = vsyncpa [#allocation4], 0  ;;  %s970_s0 = inlined_call_operand.hbm [shape: f32[8,256], index: 0, kind: input, shape index: {}]   ;;  %s971_s1 = inlined_call_operand.hbm [shape: f32[8,72], index: 1, kind: input, shape index: {}]   ;;  %s972_s2 = inlined_call_operand.hbm [shape: f32[8,72], index: 2, kind: input, shape index: {}]   ;;  %s973_s3 = inlined_call_operand.hbm [shape: f32[8,256], index: 3, kind: output, shape index: {}]  }
   0x1   :  { %9 = vsyncpa [#allocation7], 0 }
   0x2   :  { %10 = vsyncpa [#allocation5], 0  ;;  %s678_s12 = smov [#allocation6]   ;;  %s679_s14 = smov [#allocation3]  }
   0x3   :  { %s27_s13 = sshll.u32 %s678_s12, 4  ;;  %s17_s15 = sshll.u32 %s679_s14, 4  ;;  %s28_s13 = int_to_ptr.vmem [resolvable:$true] %s27_s13  ;;  %s18_s15 = int_to_ptr.vmem [resolvable:$true] %s17_s15 }
   0x4   :  { %s584_s18 = scalar_lea.hbm %s971_s1, 128 }
   0x5   :  { %p585_p0 = scmp.ne.s32.totalorder %s971_s1, %s584_s18  ;;  %p588_p1 = scmp.lt.u32.totalorder %s584_s18, %s971_s1 }
   0x7   :  { %p590_p2 = pnand %p588_p1, %p585_p0 }
   0x9   :  { %593 = shalt.err (!%p590_p2)
}
   0xa   :  { %s594_s23 = scalar_lea.vmem %s28_s13, 128  ;;  %p599_p4 = scmp.lt.s32.totalorder %s28_s13, %s28_s13 }
   0xb   :  { %p595_p3 = scmp.ne.s32.totalorder %s28_s13, %s594_s23  ;;  %p600_p5 = scmp.lt.s32.totalorder %s594_s23, %s594_s23 }
   0xd   :  { %p601_p6 = por %p600_p5, %p599_p4 }
   0xf   :  { %p602_p7 = pnand %p601_p6, %p595_p3 }
  0x11   :  { %605 = shalt.err (!%p602_p7)
}
  0x12   :  { %30 = dma.hbm_to_vmem [thread:$0]  %s971_s1, 128, %s28_s13, [#allocation7]  }
  0x13   :  { %s606_s28 = scalar_lea.hbm %s970_s0, 256 }
  0x14   :  { %p607_p8 = scmp.ne.s32.totalorder %s970_s0, %s606_s28  ;;  %p610_p9 = scmp.lt.u32.totalorder %s606_s28, %s970_s0 }
  0x16   :  { %p612_p10 = pnand %p610_p9, %p607_p8 }
  0x18   :  { %615 = shalt.err (!%p612_p10)
}
  0x19   :  { %s616_s6 = scalar_lea.vmem %s18_s15, 256  ;;  %p621_p12 = scmp.lt.s32.totalorder %s18_s15, %s18_s15 }
  0x1a   :  { %p617_p11 = scmp.ne.s32.totalorder %s18_s15, %s616_s6  ;;  %p622_p13 = scmp.lt.s32.totalorder %s616_s6, %s616_s6 }
  0x1c   :  { %p623_p0 = por %p622_p13, %p621_p12 }
  0x1e   :  { %p624_p1 = pnand %p623_p0, %p617_p11 }
  0x20   :  { %627 = shalt.err (!%p624_p1)
}
  0x21   :  { %20 = dma.hbm_to_vmem [thread:$0]  %s970_s0, 256, %s18_s15, [#allocation4]  }
  0x22   :  { %s680_s8 = smov [#allocation8]   ;;  %s628_s12 = scalar_lea.hbm %s972_s2, 128 }
  0x23   :  { %s37_s9 = sshll.u32 %s680_s8, 4  ;;  %p629_p2 = scmp.ne.s32.totalorder %s972_s2, %s628_s12  ;;  %s38_s9 = int_to_ptr.vmem [resolvable:$true] %s37_s9 }
  0x24   :  { %p632_p3 = scmp.lt.u32.totalorder %s628_s12, %s972_s2 }
  0x26   :  { %p634_p4 = pnand %p632_p3, %p629_p2 }
  0x28   :  { %637 = shalt.err (!%p634_p4)
}
  0x29   :  { %s638_s18 = scalar_lea.vmem %s38_s9, 128  ;;  %p643_p6 = scmp.lt.s32.totalorder %s38_s9, %s38_s9 }
  0x2a   :  { %p639_p5 = scmp.ne.s32.totalorder %s38_s9, %s638_s18  ;;  %p644_p7 = scmp.lt.s32.totalorder %s638_s18, %s638_s18 }
  0x2c   :  { %p645_p8 = por %p644_p7, %p643_p6 }
  0x2e   :  { %p646_p9 = pnand %p645_p8, %p639_p5 }
  0x30   :  { %649 = shalt.err (!%p646_p9)
}
  0x31   :  { %40 = dma.hbm_to_vmem [thread:$0]  %s972_s2, 128, %s38_s9, [#allocation7]  }
  0x32   :  { %672 = dma.done.wait [#allocation4], 256  }
  0x33   :  { %673 = vsyncadd [#allocation4], 4294967040 }
  0x34   :  { %674 = dma.done.wait [#allocation7], 256  }
  0x35   :  { %675 = vsyncadd [#allocation7], 4294967040  ;;  %v743_v0 = vld [vmem:[#allocation3] sm:$0xff]  ;;  %s681_s19 = smov 112   ;;  %s682_s20 = smov 16   ;;  %v749_v1 = vld [vmem:[#allocation3 + $0x8] sm:$0xff]  ;;  %v52_v2 = vlaneseq }
  0x36   :  { %94 = vrot.lane.b32.xlu1 %v743_v0, %s681_s19  ;;  %88 = vrot.lane.b32.xlu0 %v743_v0, %s682_s20  ;;  %s683_s2 = smov 127   ;;  %s684_s21 = smov 1   ;;  %v555_v13 = vpack.i.bf16 %v749_v1, %v743_v0  ;;  %v685_v17 = vmov 0.0   ;;  %vm191_vm9 = vcmask 588800   ;;  %v285_v22 = vld [vmem:[#allocation8] sm:$0xff] }
  0x37   :  { %v755_v3 = vand.u32 127, %v52_v2  ;;  %259 = vmatprep.mubr.f32.mxu0 %v685_v17  ;;  %453 = vmatprep.mubr.f32.mxu1 %v685_v17  ;;  %s686_s22 = smov [#allocation9]  }
  0x38   :  { %s487_s23 = sshll.u32 %s686_s22, 4  ;;  %s488_s23 = int_to_ptr.vmem [resolvable:$true] %s487_s23 }
  0x39   :  { %vm98_vm0 = vcmp.lt.s32.totalorder %v755_v3, 112  ;;  %vm79_vm1 = vcmp.lt.s32.totalorder %v755_v3, 16  ;;  %v775_v14 = vadd.s32 128, %v755_v3  ;;  %v59_v19 = vand.u32 15, %v755_v3  ;;  %s650_s24 = scalar_lea.vmem %s488_s23, 256  ;;  %p655_p11 = scmp.lt.s32.totalorder %s488_s23, %s488_s23 }
  0x3a   :  { %96 = vrot.lane.b32.xlu1 %v749_v1, %s681_s19  ;;  %90 = vrot.lane.b32.xlu0 %v749_v1, %s682_s20  ;;  %vm109_vm3 = vcmp.lt.s32.totalorder %v755_v3, 1  ;;  %vm116_vm4 = vcmp.lt.s32.totalorder %v755_v3, 127  ;;  %p651_p10 = scmp.ne.s32.totalorder %s488_s23, %s650_s24  ;;  %p656_p12 = scmp.lt.s32.totalorder %s650_s24, %s650_s24 }
  0x3b   :  { %vm82_vm2 = vcmp.ge.s32.totalorder %v775_v14, 240  ;;  %v66_v18 = vand.u32 15, %v775_v14  ;;  %vm802_vm6 = vcmp.eq.s32.totalorder %v59_v19, 0  ;;  %vm822_vm8 = vcmp.eq.s32.totalorder %v59_v19, 15 }
  0x3c   :  { %p657_p13 = por %p656_p12, %p655_p11 }
  0x3d   :  { %vm798_vm5 = vcmp.eq.s32.totalorder %v66_v18, 0  ;;  %vm814_vm7 = vcmp.eq.s32.totalorder %v66_v18, 15 }
  0x3e   :  { %p658_p0 = pnand %p657_p13, %p651_p10 }
  0xa8   :  { %v95_v4 = vpop.permute.xlu1 %94  ;;  %v89_v5 = vpop.permute.xlu0 %88 }
  0xac   :  { %v97_v6 = vpop.permute.xlu1 %96  ;;  %v91_v7 = vpop.permute.xlu0 %90 }
  0xad   :  { %v761_v8 = vsel %vm98_vm0, %v95_v4, %v97_v6  ;;  %v92_v9 = vsel %vm79_vm1, %v89_v5, %v91_v7  ;;  %v93_v10 = vsel %vm79_vm1, %v91_v7, %v89_v5  ;;  %v100_v15 = vsel %vm98_vm0, %v97_v6, %v95_v4 }
  0xae   :  { %v101_v11 = vsel %vm79_vm1, %v761_v8, %v93_v10  ;;  %v784_v16 = vsel %vm82_vm2, %v92_v9, %v100_v15  ;;  %v87_v10 = vld [vmem:[#allocation6] sm:$0xff] }
  0xaf   :  { %v550_v12 = vpack.i.bf16 %v92_v9, %v101_v11 }
  0xb1   :  { %551 = vrot.lane.b32.xlu1 %v550_v12, %s683_s2  ;;  %541 = vrot.lane.b32.xlu0 %v550_v12, %s684_s21 }
  0xb5   :  { %556 = vrot.lane.b32.xlu1 %v555_v13, %s683_s2  ;;  %546 = vrot.lane.b32.xlu0 %v555_v13, %s684_s21 }
  0xb9   :  { %151 = vrot.lane.b32.xlu0 %v761_v8, %s684_s21  ;;  %153 = vrot.lane.b32.xlu1 %v784_v16, %s684_s21 }
  0xbd   :  { %157 = vrot.lane.b32.xlu0 %v761_v8, %s683_s2  ;;  %159 = vrot.lane.b32.xlu1 %v784_v16, %s683_s2 }
 0x123   :  { %v552_v20 = vpop.permute.xlu1 %551  ;;  %v542_v21 = vpop.permute.xlu0 %541 }
 0x124   :  { %v554_v24 = vunpack.i.h.bf16 %v552_v20  ;;  %v553_v25 = vunpack.i.l.bf16 %v552_v20  ;;  %v544_v26 = vunpack.i.h.bf16 %v542_v21  ;;  %v543_v27 = vunpack.i.l.bf16 %v542_v21 }
 0x126   :  { %v110_v28 = vsel %vm109_vm3, %v543_v27, %v544_v26  ;;  %v118_v29 = vsel %vm116_vm4, %v554_v24, %v553_v25  ;;  %v111_v30 = vsel %vm109_vm3, %v544_v26, %v543_v27  ;;  %v117_v31 = vsel %vm116_vm4, %v553_v25, %v554_v24 }
 0x127   :  { %v557_v33 = vpop.permute.xlu1 %556  ;;  %v547_v34 = vpop.permute.xlu0 %546  ;;  %v120_v35 = vsel %vm798_vm5, %v118_v29, %v110_v28  ;;  %v119_v36 = vsel %vm802_vm6, %v117_v31, %v111_v30  ;;  %v126_v50 = vsel %vm814_vm7, %v110_v28, %v118_v29  ;;  %v125_v52 = vsel %vm822_vm8, %v111_v30, %v117_v31 }
 0x128   :  { %v559_v38 = vunpack.i.h.bf16 %v557_v33  ;;  %v558_v39 = vunpack.i.l.bf16 %v557_v33  ;;  %v549_v40 = vunpack.i.h.bf16 %v547_v34  ;;  %v548_v41 = vunpack.i.l.bf16 %v547_v34 }
 0x129   :  { %v499_v42 = vpack.c.bf16 %v92_v9, %v120_v35  ;;  %v501_v43 = vpack.c.bf16 %v101_v11, %v119_v36 }
 0x12a   :  { %v139_v44 = vsel %vm116_vm4, %v558_v39, %v559_v38  ;;  %v140_v45 = vsel %vm116_vm4, %v559_v38, %v558_v39  ;;  %v133_v46 = vsel %vm109_vm3, %v548_v41, %v549_v40  ;;  %v134_v47 = vsel %vm109_vm3, %v549_v40, %v548_v41 }
 0x12b   :  { %500 = vmatprep.subr.bf16.mxu0 %v499_v42  ;;  %v152_v48 = vpop.permute.xlu0 %151  ;;  %v154_v49 = vpop.permute.xlu1 %153  ;;  %v142_v51 = vsel %vm798_vm5, %v140_v45, %v133_v46  ;;  %v141_v53 = vsel %vm802_vm6, %v139_v44, %v134_v47  ;;  %v148_v56 = vsel %vm814_vm7, %v133_v46, %v140_v45  ;;  %v147_v60 = vsel %vm822_vm8, %v134_v47, %v139_v44 }
 0x12c   :  { %502 = vmatpush1.bf16.msra.mxu0 %v501_v43  ;;  %v503_v54 = vpack.c.bf16 %v142_v51, %v126_v50  ;;  %v505_v55 = vpack.c.bf16 %v141_v53, %v125_v52  ;;  %v507_v59 = vpack.c.bf16 %v148_v56, %v749_v1  ;;  %v155_v61 = vsel %vm109_vm3, %v152_v48, %v154_v49 }
 0x12d   :  { %v156_v1 = vsel %vm109_vm3, %v154_v49, %v152_v48  ;;  %v509_v4 = vpack.c.bf16 %v147_v60, %v743_v0 }
 0x12e   :  { %504 = vmatprep.subr.bf16.mxu0 %v503_v54 }
 0x12f   :  { %v158_v57 = vpop.permute.xlu0 %157  ;;  %v160_v58 = vpop.permute.xlu1 %159 }
 0x130   :  { %506 = vmatpush1.bf16.msra.mxu0 %v505_v55  ;;  %v161_v62 = vsel %vm116_vm4, %v158_v57, %v160_v58  ;;  %v162_v63 = vsel %vm116_vm4, %v160_v58, %v158_v57 }
 0x131   :  { %v164_v2 = vsel %vm798_vm5, %v162_v63, %v155_v61  ;;  %508 = vmatprep.subr.bf16.mxu0 %v507_v59  ;;  %v163_v6 = vsel %vm802_vm6, %v161_v62, %v156_v1  ;;  %v170_v9 = vsel %vm814_vm7, %v155_v61, %v162_v63  ;;  %v169_v11 = vsel %vm822_vm8, %v156_v1, %v161_v62 }
 0x132   :  { %v511_v5 = vpack.c.bf16 %v784_v16, %v164_v2  ;;  %v513_v7 = vpack.c.bf16 %v761_v8, %v163_v6 }
 0x134   :  { %510 = vmatpush1.bf16.msra.mxu0 %v509_v4 }
 0x135   :  { %512 = vmatprep.subr.bf16.mxu0 %v511_v5 }
 0x138   :  { %514 = vmatpush1.bf16.msra.mxu0 %v513_v7 }
 0x139   :  { %211 = vmatprep.subr.mxu0 %v170_v9 }
 0x13c   :  { %212 = vmatpush1.msra.mxu0 %v169_v11 }
 0x13d   :  { %497 = vmatmul.mubr.msk.f32.vlgmr.msra.gmra.mrb[0].mxu0 %vm191_vm9, %v87_v10 }
 0x210   :  { %v261_v0 = vpop.f32.mrb[0].mxu0 }
 0x211   :  { %v263_v12 = vpop.f32.mrb[1].mxu0  ;;  %v270_v13 = vmul.f32 %v261_v0, %v261_v0 }
 0x212   :  { %v271_v15 = vmul.f32 %v263_v12, %v263_v12  ;;  %v266_v16 = vadd.f32 %v263_v12, %v261_v0 }
 0x214   :  { %267 = vadd.xlane.f32.xlu0 %v266_v16  ;;  %v272_v8 = vadd.f32 %v271_v15, %v270_v13 }
 0x216   :  { %273 = vadd.xlane.f32.xlu1 %v272_v8 }
 0x2a1   :  { %v268_v17 = vpop.xlane.xlu0 %267 }
 0x2a2   :  { %v269_v18 = vmul.f32 0.00390625, %v268_v17 }
 0x2a3   :  { %v274_v19 = vpop.xlane.xlu1 %273 }
 0x2a4   :  { %v275_v20 = vmul.f32 0.00390625, %v274_v19  ;;  %v276_v21 = vmul.f32 %v269_v18, %v269_v18  ;;  %v279_v27 = vsub.f32 %v261_v0, %v269_v18  ;;  %v280_v28 = vsub.f32 %v263_v12, %v269_v18 }
 0x2a6   :  { %v277_v24 = vsub.f32 %v275_v20, %v276_v21 }
 0x2a8   :  { %v278_v25 = vmax.f32 %v277_v24, 0.0 }
 0x2aa   :  { %v281_v26 = vadd.f32 1e-05, %v278_v25 }
 0x2ac   :  { %580 = vrsqrt.f32 %v281_v26 }
 0x2b6   :  { %v581_v29 = vpop.eup %580 }
 0x2b7   :  { %v867_v30 = vmul.f32 %v581_v29, %v280_v28  ;;  %v869_v31 = vmul.f32 %v581_v29, %v279_v27 }
 0x2b9   :  { %288 = vrot.lane.b32.xlu1 %v867_v30, %s682_s20  ;;  %286 = vrot.lane.b32.xlu0 %v869_v31, %s682_s20  ;;  %v575_v43 = vpack.i.bf16 %v867_v30, %v869_v31 }
 0x2bd   :  { %294 = vrot.lane.b32.xlu1 %v867_v30, %s681_s19  ;;  %292 = vrot.lane.b32.xlu0 %v869_v31, %s681_s19 }
 0x32b   :  { %v289_v33 = vpop.permute.xlu1 %288  ;;  %v287_v34 = vpop.permute.xlu0 %286 }
 0x32c   :  { %v291_v38 = vsel %vm79_vm1, %v289_v33, %v287_v34  ;;  %v290_v40 = vsel %vm79_vm1, %v287_v34, %v289_v33 }
 0x32f   :  { %v295_v35 = vpop.permute.xlu1 %294  ;;  %v293_v36 = vpop.permute.xlu0 %292 }
 0x330   :  { %v883_v39 = vsel %vm98_vm0, %v293_v36, %v295_v35  ;;  %v297_v44 = vsel %vm98_vm0, %v295_v35, %v293_v36 }
 0x331   :  { %v298_v41 = vsel %vm79_vm1, %v883_v39, %v291_v38  ;;  %v301_v45 = vsel %vm82_vm2, %v290_v40, %v297_v44 }
 0x332   :  { %v570_v42 = vpack.i.bf16 %v290_v40, %v298_v41 }
 0x334   :  { %571 = vrot.lane.b32.xlu1 %v570_v42, %s683_s2  ;;  %561 = vrot.lane.b32.xlu0 %v570_v42, %s684_s21 }
 0x338   :  { %576 = vrot.lane.b32.xlu1 %v575_v43, %s683_s2  ;;  %566 = vrot.lane.b32.xlu0 %v575_v43, %s684_s21 }
 0x33c   :  { %348 = vrot.lane.b32.xlu1 %v301_v45, %s684_s21  ;;  %346 = vrot.lane.b32.xlu0 %v883_v39, %s684_s21 }
 0x340   :  { %354 = vrot.lane.b32.xlu1 %v301_v45, %s683_s2  ;;  %352 = vrot.lane.b32.xlu0 %v883_v39, %s683_s2 }
 0x3a6   :  { %v572_v46 = vpop.permute.xlu1 %571  ;;  %v562_v47 = vpop.permute.xlu0 %561 }
 0x3a7   :  { %v574_v48 = vunpack.i.h.bf16 %v572_v46  ;;  %v573_v49 = vunpack.i.l.bf16 %v572_v46  ;;  %v564_v50 = vunpack.i.h.bf16 %v562_v47  ;;  %v563_v51 = vunpack.i.l.bf16 %v562_v47 }
 0x3a9   :  { %v306_v14 = vsel %vm109_vm3, %v563_v51, %v564_v50  ;;  %v313_v52 = vsel %vm116_vm4, %v574_v48, %v573_v49  ;;  %v307_v53 = vsel %vm109_vm3, %v564_v50, %v563_v51  ;;  %v312_v54 = vsel %vm116_vm4, %v573_v49, %v574_v48 }
 0x3aa   :  { %v577_v55 = vpop.permute.xlu1 %576  ;;  %v567_v56 = vpop.permute.xlu0 %566  ;;  %v315_v57 = vsel %vm798_vm5, %v313_v52, %v306_v14  ;;  %v314_v58 = vsel %vm802_vm6, %v312_v54, %v307_v53  ;;  %v321_v10 = vsel %vm814_vm7, %v306_v14, %v313_v52  ;;  %v320_v0 = vsel %vm822_vm8, %v307_v53, %v312_v54 }
 0x3ab   :  { %v579_v59 = vunpack.i.h.bf16 %v577_v55  ;;  %v578_v60 = vunpack.i.l.bf16 %v577_v55  ;;  %v569_v61 = vunpack.i.h.bf16 %v567_v56  ;;  %v568_v62 = vunpack.i.l.bf16 %v567_v56 }
 0x3ac   :  { %v515_v63 = vpack.c.bf16 %v290_v40, %v315_v57  ;;  %v517_v2 = vpack.c.bf16 %v298_v41, %v314_v58 }
 0x3ad   :  { %v334_v1 = vsel %vm116_vm4, %v578_v60, %v579_v59  ;;  %v335_v4 = vsel %vm116_vm4, %v579_v59, %v578_v60  ;;  %v328_v5 = vsel %vm109_vm3, %v568_v62, %v569_v61  ;;  %v329_v6 = vsel %vm109_vm3, %v569_v61, %v568_v62 }
 0x3ae   :  { %516 = vmatprep.subr.bf16.mxu1 %v515_v63  ;;  %v349_v7 = vpop.permute.xlu1 %348  ;;  %v347_v9 = vpop.permute.xlu0 %346  ;;  %v337_v11 = vsel %vm798_vm5, %v335_v4, %v328_v5  ;;  %v336_v12 = vsel %vm802_vm6, %v334_v1, %v329_v6  ;;  %v343_v16 = vsel %vm814_vm7, %v328_v5, %v335_v4  ;;  %v342_v19 = vsel %vm822_vm8, %v329_v6, %v334_v1 }
 0x3af   :  { %518 = vmatpush1.bf16.msra.mxu1 %v517_v2  ;;  %v519_v13 = vpack.c.bf16 %v337_v11, %v321_v10  ;;  %v521_v15 = vpack.c.bf16 %v336_v12, %v320_v0  ;;  %v523_v18 = vpack.c.bf16 %v343_v16, %v867_v30  ;;  %v350_v20 = vsel %vm109_vm3, %v347_v9, %v349_v7 }
 0x3b0   :  { %v351_v26 = vsel %vm109_vm3, %v349_v7, %v347_v9  ;;  %v525_v27 = vpack.c.bf16 %v342_v19, %v869_v31 }
 0x3b1   :  { %520 = vmatprep.subr.bf16.mxu1 %v519_v13 }
 0x3b2   :  { %v355_v8 = vpop.permute.xlu1 %354  ;;  %v353_v17 = vpop.permute.xlu0 %352 }
 0x3b3   :  { %v356_v21 = vsel %vm116_vm4, %v353_v17, %v355_v8  ;;  %v357_v24 = vsel %vm116_vm4, %v355_v8, %v353_v17  ;;  %522 = vmatpush1.bf16.msra.mxu1 %v521_v15 }
 0x3b4   :  { %v359_v25 = vsel %vm798_vm5, %v357_v24, %v350_v20  ;;  %524 = vmatprep.subr.bf16.mxu1 %v523_v18  ;;  %v358_v29 = vsel %vm802_vm6, %v356_v21, %v351_v26  ;;  %v365_v33 = vsel %vm814_vm7, %v350_v20, %v357_v24  ;;  %v364_v3 = vsel %vm822_vm8, %v351_v26, %v356_v21 }
 0x3b5   :  { %v527_v28 = vpack.c.bf16 %v301_v45, %v359_v25  ;;  %v529_v30 = vpack.c.bf16 %v883_v39, %v358_v29 }
 0x3b7   :  { %526 = vmatpush1.bf16.msra.mxu1 %v525_v27 }
 0x3b8   :  { %528 = vmatprep.subr.bf16.mxu1 %v527_v28 }
 0x3bb   :  { %530 = vmatpush1.bf16.msra.mxu1 %v529_v30 }
 0x3bc   :  { %405 = vmatprep.subr.mxu1 %v365_v33 }
 0x3bf   :  { %406 = vmatpush1.msra.mxu1 %v364_v3 }
 0x3c0   :  { %498 = vmatmul.mubr.msk.f32.vlgmr.msra.gmra.mrb[0].mxu1 %vm191_vm9, %v285_v22 }
 0x493   :  { %v455_v31 = vpop.f32.mrb[0].mxu1 }
 0x494   :  { %v457_v34 = vpop.f32.mrb[1].mxu1  ;;  %v464_v23 = vmul.f32 %v455_v31, %v455_v31 }
 0x495   :  { %v465_v35 = vmul.f32 %v457_v34, %v457_v34  ;;  %v460_v36 = vadd.f32 %v457_v34, %v455_v31 }
 0x497   :  { %461 = vadd.xlane.f32.xlu0 %v460_v36  ;;  %v466_v38 = vadd.f32 %v465_v35, %v464_v23 }
 0x499   :  { %467 = vadd.xlane.f32.xlu1 %v466_v38 }
 0x524   :  { %v462_v39 = vpop.xlane.xlu0 %461 }
 0x525   :  { %v463_v40 = vmul.f32 0.00390625, %v462_v39 }
 0x526   :  { %v468_v32 = vpop.xlane.xlu1 %467 }
 0x527   :  { %v469_v41 = vmul.f32 0.00390625, %v468_v32  ;;  %v470_v42 = vmul.f32 %v463_v40, %v463_v40  ;;  %v473_v45 = vsub.f32 %v455_v31, %v463_v40  ;;  %v474_v46 = vsub.f32 %v457_v34, %v463_v40 }
 0x529   :  { %v471_v43 = vsub.f32 %v469_v41, %v470_v42 }
 0x52b   :  { %v472_v44 = vmax.f32 %v471_v43, 0.0 }
 0x52d   :  { %v475_v37 = vadd.f32 1e-05, %v472_v44 }
 0x52f   :  { %582 = vrsqrt.f32 %v475_v37 }
 0x539   :  { %v583_v47 = vpop.eup %582 }
 0x53a   :  { %v477_v48 = vmul.f32 %v583_v47, %v473_v45  ;;  %v478_v49 = vmul.f32 %v583_v47, %v474_v46 }
 0x53c   :  { %479 = vst [vmem:[#allocation9] sm:$0xff] %v477_v48  ;;  %480 = vst [vmem:[#allocation9 + $0x8] sm:$0xff] %v478_v49 }
 0x53d   :  { %661 = shalt.err (!%p658_p0)
}
 0x53e   :  { %s662_s27 = scalar_lea.hbm %s973_s3, 256 }
 0x53f   :  { %p663_p1 = scmp.ne.s32.totalorder %s973_s3, %s662_s27  ;;  %p666_p2 = scmp.lt.u32.totalorder %s662_s27, %s973_s3 }
 0x541   :  { %p668_p3 = pnand %p666_p2, %p663_p1 }
 0x543   :  { %671 = shalt.err (!%p668_p3)
}
 0x544   :  { %490 = dma.vmem_to_hbm [thread:$0]  %s488_s23, 256, %s973_s3, [#allocation5]  }
 0x545   :  { %676 = dma.done.wait [#allocation5], 256  }
 0x546   :  { %677 = vsyncadd [#allocation5], 4294967040 }
 0x547   :  { %494 = vsyncpa [#allocation4], 1 }
 0x548   :  { %495 = vsyncpa [#allocation7], 1 }
 0x549   :  { %496 = vsyncpa [#allocation5], 1 }

</bundles_post_ra>
